<compile_context>
chip_gen: v5e
topology: v5e:2x2
jax: 0.10.0
libtpu: 0.0.40
codegen_flags: <defaults>
</compile_context>

<pallas_src>
import jax
import jax.numpy as jnp
from jax.experimental import pallas as pl
from jax.experimental.pallas import tpu as pltpu

BN_EPS = 1e-5
H1, H2, H3 = 128, 64, 32


def realestate_kernel(
    x_ref,          # (tb, in_dim)  bf16
    w1_ref,         # (in_dim, 128) bf16
    bst1_ref,       # (3, 128) f32: rows = [b1, bn1_scale, bn1_shift]
    w2_ref,         # (128, 64) bf16
    bst2_ref,       # (3, 64)  f32: rows = [b2, bn2_scale, bn2_shift]
    w3_ref,         # (64, 32) bf16
    bw_ref,         # (2, 32)  f32: rows = [b3, w4_row]
    b4_ref,         # (1, 1)   f32 in SMEM
    o_ref,          # (1, tb)  f32 (lane-dense output slab)
):
    # input_layer: Linear(in, 128) + ReLU   (bf16 MXU, f32 accumulate)
    h = jnp.dot(x_ref[...], w1_ref[...], preferred_element_type=jnp.float32)
    h = jnp.maximum(h + bst1_ref[0:1, :], 0.0)                        # (tb, 128)

    # block: BN(128) -> ReLU -> Dropout -> Linear(128,64) -> BN(64) -> ReLU
    #        -> Dropout -> Linear(64,32) -> ReLU
    # BN pre-folded into scale/shift -> single FMA per BN.
    # TODO(synk): Dropout(p=0.3 / p=0.2) is identity in eval mode; training
    # RNG masking is not implemented here.
    h = jnp.maximum(h * bst1_ref[1:2, :] + bst1_ref[2:3, :], 0.0)     # (tb, 128)
    h = jnp.dot(h.astype(jnp.bfloat16), w2_ref[...],
                preferred_element_type=jnp.float32) + bst2_ref[0:1, :]
    h = jnp.maximum(h * bst2_ref[1:2, :] + bst2_ref[2:3, :], 0.0)     # (tb, 64)
    h = jnp.dot(h.astype(jnp.bfloat16), w3_ref[...],
                preferred_element_type=jnp.float32) + bw_ref[0:1, :]  # (tb, 32)
    h = jnp.maximum(h, 0.0)

    # output_layer: Linear(32, 1) as VPU multiply + cross-lane reduce, then a
    # single relayout of the (tb,) result to the lane-dense (1, tb) block.
    res = jnp.sum(h * bw_ref[1:2, :], axis=-1) + b4_ref[0, 0]         # (tb,)
    o_ref[...] = res.reshape(1, -1)                                   # (1, tb)


def _round_up(n, m):
    return ((n + m - 1) // m) * m


def _choose_tiling(batch):
    """Pick (tb, num_tiles): amortize ~0.35us/step, minimize tail padding,
    tb multiple of 128 (unmasked lane-dense stores), tb <= 2048 (v5e scoped
    VMEM safe), even tile count for v7x's 2-TC megacore split."""
    b8 = _round_up(batch, 8)
    if b8 <= 1024:
        return b8, 1                       # single tile: overhead-dominated
    num_tiles = max(2, pl.cdiv(b8, 2048))
    if num_tiles % 2:
        num_tiles += 1                     # even split across v7x TensorCores
    tb = _round_up(pl.cdiv(b8, num_tiles), 128)
    return tb, num_tiles


@jax.jit
def realestate_forward(x, params):
    batch, in_dim = x.shape
    tb, num_tiles = _choose_tiling(batch)
    padded = tb * num_tiles

    # Ship x as bf16 (it is consumed in bf16 by the MXU anyway): halves the
    # dominant, lane-padded HBM->VMEM stream and the double-buffered block.
    x = x.astype(jnp.bfloat16)
    if padded != batch:
        x = jnp.pad(x, ((0, padded - batch), (0, 0)))

    args = (
        x,
        params["w1"], params["bst1"],
        params["w2"], params["bst2"],
        params["w3"], params["bw"],
        params["b4"],
    )

    def resident(shape):
        # Same block index every step -> Pallas keeps it VMEM-resident.
        return pl.BlockSpec(shape, lambda i: (0, 0))

    in_specs = [
        pl.BlockSpec((tb, in_dim), lambda i: (i, 0)),          # x: tiled batch
        resident((in_dim, H1)), resident((3, H1)),
        resident((H1, H2)), resident((3, H2)),
        resident((H2, H3)), resident((2, H3)),
        pl.BlockSpec(memory_space=pltpu.MemorySpace.SMEM),     # b4 scalar
    ]
    out_spec = pl.BlockSpec((1, tb), lambda i: (i, 0))

    flops = 2 * padded * (in_dim * H1 + H1 * H2 + H2 * H3 + H3)
    # Account for lane padding of the tiled HBM layout: x last dim (8) pads to
    # 128 lanes; output is a lane-dense f32 slab.
    bytes_accessed = (
        padded * 128 * 2                                       # x (bf16)
        + _round_up(num_tiles, 8) * tb * 4                     # out slab (f32)
        + sum(int(a.size) * a.dtype.itemsize for a in args[1:])
    )

    out = pl.pallas_call(
        realestate_kernel,
        grid=(num_tiles,),
        in_specs=in_specs,
        out_specs=out_spec,
        out_shape=jax.ShapeDtypeStruct((num_tiles, tb), jnp.float32),
        compiler_params=pltpu.CompilerParams(
            dimension_semantics=("parallel",)),
        cost_estimate=pl.CostEstimate(
            flops=flops, transcendentals=0, bytes_accessed=bytes_accessed),
    )(*args)
    # Un-flatten the lane-dense slab back to (batch, 1).
    return out.reshape(-1, 1)[:batch]


def init_params(key, input_dim=8):
    """Raw f32 parameters mirroring the PyTorch module (weights transposed)."""
    keys = jax.random.split(key, 12)

    def lin(kw, kb, fan_in, fan_out):
        bound = 1.0 / jnp.sqrt(fan_in)
        w = jax.random.uniform(kw, (fan_in, fan_out), jnp.float32, -bound, bound)
        b = jax.random.uniform(kb, (1, fan_out), jnp.float32, -bound, bound)
        return w, b

    w1, b1 = lin(keys[0], keys[1], input_dim, H1)
    w2, b2 = lin(keys[2], keys[3], H1, H2)
    w3, b3 = lin(keys[4], keys[5], H2, H3)
    w4, b4 = lin(keys[6], keys[7], H3, 1)

    bn1_gamma = 1.0 + 0.1 * jax.random.normal(keys[8], (1, H1), jnp.float32)
    bn1_beta = 0.1 * jax.random.normal(keys[9], (1, H1), jnp.float32)
    bn1_mean = 0.05 * jax.random.normal(keys[10], (1, H1), jnp.float32)
    bn1_var = jnp.ones((1, H1), jnp.float32)

    bn2_gamma = 1.0 + 0.1 * jax.random.normal(keys[11], (1, H2), jnp.float32)
    bn2_beta = jnp.zeros((1, H2), jnp.float32)
    bn2_mean = jnp.zeros((1, H2), jnp.float32)
    bn2_var = jnp.ones((1, H2), jnp.float32)

    return dict(
        w1=w1, b1=b1, bn1_gamma=bn1_gamma, bn1_beta=bn1_beta,
        bn1_mean=bn1_mean, bn1_var=bn1_var,
        w2=w2, b2=b2, bn2_gamma=bn2_gamma, bn2_beta=bn2_beta,
        bn2_mean=bn2_mean, bn2_var=bn2_var,
        w3=w3, b3=b3, w4=w4, b4=b4,
    )


def prepare_params(p):
    """One-time prep: fold BN to scale/shift, bf16 MXU weights, consolidated
    resident vectors (bias/scale/shift stacked), scalar b4 for SMEM."""
    def fold(gamma, beta, mean, var):
        scale = gamma * jax.lax.rsqrt(var + BN_EPS)
        shift = beta - mean * scale
        return scale, shift

    s1, t1 = fold(p["bn1_gamma"], p["bn1_beta"], p["bn1_mean"], p["bn1_var"])
    s2, t2 = fold(p["bn2_gamma"], p["bn2_beta"], p["bn2_mean"], p["bn2_var"])
    return dict(
        w1=p["w1"].astype(jnp.bfloat16),
        bst1=jnp.concatenate([p["b1"], s1, t1], axis=0),               # (3, 128)
        w2=p["w2"].astype(jnp.bfloat16),
        bst2=jnp.concatenate([p["b2"], s2, t2], axis=0),               # (3, 64)
        w3=p["w3"].astype(jnp.bfloat16),
        bw=jnp.concatenate([p["b3"], p["w4"].reshape(1, H3)], axis=0),  # (2, 32)
        b4=p["b4"].reshape(1, 1).astype(jnp.float32),
    )


def reference_forward(x, p):
    """Pure-JAX f32 reference of the PyTorch eval-mode forward pass."""
    h = jnp.maximum(x @ p["w1"] + p["b1"], 0.0)
    h = (h - p["bn1_mean"]) * jax.lax.rsqrt(p["bn1_var"] + BN_EPS) \
        * p["bn1_gamma"] + p["bn1_beta"]
    h = jnp.maximum(h, 0.0)
    h = h @ p["w2"] + p["b2"]
    h = (h - p["bn2_mean"]) * jax.lax.rsqrt(p["bn2_var"] + BN_EPS) \
        * p["bn2_gamma"] + p["bn2_beta"]
    h = jnp.maximum(h, 0.0)
    h = jnp.maximum(h @ p["w3"] + p["b3"], 0.0)
    return h @ p["w4"] + p["b4"]


if __name__ == "__main__":
    key = jax.random.PRNGKey(0)
    k_params, k_x, k_x2 = jax.random.split(key, 3)

    batch, input_dim = 8, 8
    raw = init_params(k_params, input_dim=input_dim)
    params = prepare_params(raw)

    # Small-shape check (single tile).
    x = jax.random.normal(k_x, (batch, input_dim), jnp.float32)
    out = jax.block_until_ready(realestate_forward(x, params))
    ref = reference_forward(x, raw)
    assert out.shape == (batch, 1), out.shape
    assert jnp.allclose(out, ref, atol=5e-2, rtol=5e-2), (out, ref)

    # Multi-tile + ragged-batch check (grid, padding, resident weights,
    # lane-dense output slab, even tile count: 2500 -> tb=1280, 2 tiles).
    big_batch = 2500
    x2 = jax.random.normal(k_x2, (big_batch, input_dim), jnp.float32)
    out2 = jax.block_until_ready(realestate_forward(x2, params))
    ref2 = reference_forward(x2, raw)
    assert out2.shape == (big_batch, 1), out2.shape
    assert jnp.allclose(out2, ref2, atol=5e-2, rtol=5e-2)

    print("KERNEL_OK")
</pallas_src>

<mosaic_0001>
module attributes {stable_mosaic.version = 11 : i64} {
  func.func @realestate_kernel(%arg0: i32, %arg1: memref<8x8xbf16, #tpu.memory_space<vmem>>, %arg2: memref<8x128xbf16, #tpu.memory_space<vmem>>, %arg3: memref<3x128xf32, #tpu.memory_space<vmem>>, %arg4: memref<128x64xbf16, #tpu.memory_space<vmem>>, %arg5: memref<3x64xf32, #tpu.memory_space<vmem>>, %arg6: memref<64x32xbf16, #tpu.memory_space<vmem>>, %arg7: memref<2x32xf32, #tpu.memory_space<vmem>>, %arg8: memref<1x1xf32, #tpu.memory_space<smem>>, %arg9: memref<1x8xf32, #tpu.memory_space<vmem>>) attributes {dimension_semantics = [#tpu.dimension_semantics<parallel>], iteration_bounds = array<i64: 1>, scalar_prefetch = 0 : i64, scratch_operands = 0 : i64, tpu.core_type = #tpu.core_type<tc>, window_params = [{transform_indices = @transform_0, window_bounds = array<i64: 8, 8>}, {pipeline_mode = #tpu.pipeline_mode<synchronous>, transform_indices = @transform_1, window_bounds = array<i64: 8, 128>}, {pipeline_mode = #tpu.pipeline_mode<synchronous>, transform_indices = @transform_2, window_bounds = array<i64: 3, 128>}, {pipeline_mode = #tpu.pipeline_mode<synchronous>, transform_indices = @transform_3, window_bounds = array<i64: 128, 64>}, {pipeline_mode = #tpu.pipeline_mode<synchronous>, transform_indices = @transform_4, window_bounds = array<i64: 3, 64>}, {pipeline_mode = #tpu.pipeline_mode<synchronous>, transform_indices = @transform_5, window_bounds = array<i64: 64, 32>}, {pipeline_mode = #tpu.pipeline_mode<synchronous>, transform_indices = @transform_6, window_bounds = array<i64: 2, 32>}, {transform_indices = @transform_7, window_bounds = array<i64: 1, 1>}, {transform_indices = @transform_8, window_bounds = array<i64: 1, 8>}]} {
    %c0 = arith.constant 0 : index
    %c0_0 = arith.constant 0 : index
    %0 = vector.load %arg1[%c0, %c0_0] : memref<8x8xbf16, #tpu.memory_space<vmem>>, vector<8x8xbf16>
    %c0_1 = arith.constant 0 : index
    %c0_2 = arith.constant 0 : index
    %1 = vector.load %arg2[%c0_1, %c0_2] : memref<8x128xbf16, #tpu.memory_space<vmem>>, vector<8x128xbf16>
    %cst = arith.constant dense<0.000000e+00> : vector<8x128xf32>
    %2 = tpu.matmul %0, %1, %cst {dimension_numbers = #tpu.dot_dimension_numbers<[1], [0], [0], [1], [0, 0, 1, 1], [], []>} : vector<8x8xbf16>, vector<8x128xbf16>, vector<8x128xf32> -> vector<8x128xf32>
    %c0_3 = arith.constant 0 : index
    %c0_4 = arith.constant 0 : index
    %3 = vector.load %arg3[%c0_3, %c0_4] : memref<3x128xf32, #tpu.memory_space<vmem>>, vector<1x128xf32>
    %4 = vector.broadcast %3 : vector<1x128xf32> to vector<8x128xf32>
    %5 = arith.addf %2, %4 : vector<8x128xf32>
    %cst_5 = arith.constant 0.000000e+00 : f32
    %6 = vector.broadcast %cst_5 : f32 to vector<8x128xf32>
    %7 = arith.maximumf %5, %6 : vector<8x128xf32>
    %c1 = arith.constant 1 : index
    %c0_6 = arith.constant 0 : index
    %8 = vector.load %arg3[%c1, %c0_6] : memref<3x128xf32, #tpu.memory_space<vmem>>, vector<1x128xf32>
    %9 = vector.broadcast %8 : vector<1x128xf32> to vector<8x128xf32>
    %10 = arith.mulf %7, %9 : vector<8x128xf32>
    %c2 = arith.constant 2 : index
    %c0_7 = arith.constant 0 : index
    %11 = vector.load %arg3[%c2, %c0_7] : memref<3x128xf32, #tpu.memory_space<vmem>>, vector<1x128xf32>
    %12 = vector.broadcast %11 : vector<1x128xf32> to vector<8x128xf32>
    %13 = arith.addf %10, %12 : vector<8x128xf32>
    %cst_8 = arith.constant 0.000000e+00 : f32
    %14 = vector.broadcast %cst_8 : f32 to vector<8x128xf32>
    %15 = arith.maximumf %13, %14 : vector<8x128xf32>
    %16 = arith.truncf %15 : vector<8x128xf32> to vector<8x128xbf16>
    %c0_9 = arith.constant 0 : index
    %c0_10 = arith.constant 0 : index
    %17 = vector.load %arg4[%c0_9, %c0_10] : memref<128x64xbf16, #tpu.memory_space<vmem>>, vector<128x64xbf16>
    %cst_11 = arith.constant dense<0.000000e+00> : vector<8x64xf32>
    %18 = tpu.matmul %16, %17, %cst_11 {dimension_numbers = #tpu.dot_dimension_numbers<[1], [0], [0], [1], [0, 0, 1, 1], [], []>} : vector<8x128xbf16>, vector<128x64xbf16>, vector<8x64xf32> -> vector<8x64xf32>
    %c0_12 = arith.constant 0 : index
    %c0_13 = arith.constant 0 : index
    %19 = vector.load %arg5[%c0_12, %c0_13] : memref<3x64xf32, #tpu.memory_space<vmem>>, vector<1x64xf32>
    %20 = vector.broadcast %19 : vector<1x64xf32> to vector<8x64xf32>
    %21 = arith.addf %18, %20 : vector<8x64xf32>
    %c1_14 = arith.constant 1 : index
    %c0_15 = arith.constant 0 : index
    %22 = vector.load %arg5[%c1_14, %c0_15] : memref<3x64xf32, #tpu.memory_space<vmem>>, vector<1x64xf32>
    %23 = vector.broadcast %22 : vector<1x64xf32> to vector<8x64xf32>
    %24 = arith.mulf %21, %23 : vector<8x64xf32>
    %c2_16 = arith.constant 2 : index
    %c0_17 = arith.constant 0 : index
    %25 = vector.load %arg5[%c2_16, %c0_17] : memref<3x64xf32, #tpu.memory_space<vmem>>, vector<1x64xf32>
    %26 = vector.broadcast %25 : vector<1x64xf32> to vector<8x64xf32>
    %27 = arith.addf %24, %26 : vector<8x64xf32>
    %cst_18 = arith.constant 0.000000e+00 : f32
    %28 = vector.broadcast %cst_18 : f32 to vector<8x64xf32>
    %29 = arith.maximumf %27, %28 : vector<8x64xf32>
    %30 = arith.truncf %29 : vector<8x64xf32> to vector<8x64xbf16>
    %c0_19 = arith.constant 0 : index
    %c0_20 = arith.constant 0 : index
    %31 = vector.load %arg6[%c0_19, %c0_20] : memref<64x32xbf16, #tpu.memory_space<vmem>>, vector<64x32xbf16>
    %cst_21 = arith.constant dense<0.000000e+00> : vector<8x32xf32>
    %32 = tpu.matmul %30, %31, %cst_21 {dimension_numbers = #tpu.dot_dimension_numbers<[1], [0], [0], [1], [0, 0, 1, 1], [], []>} : vector<8x64xbf16>, vector<64x32xbf16>, vector<8x32xf32> -> vector<8x32xf32>
    %c0_22 = arith.constant 0 : index
    %c0_23 = arith.constant 0 : index
    %33 = vector.load %arg7[%c0_22, %c0_23] : memref<2x32xf32, #tpu.memory_space<vmem>>, vector<1x32xf32>
    %34 = vector.broadcast %33 : vector<1x32xf32> to vector<8x32xf32>
    %35 = arith.addf %32, %34 : vector<8x32xf32>
    %cst_24 = arith.constant 0.000000e+00 : f32
    %36 = vector.broadcast %cst_24 : f32 to vector<8x32xf32>
    %37 = arith.maximumf %35, %36 : vector<8x32xf32>
    %c1_25 = arith.constant 1 : index
    %c0_26 = arith.constant 0 : index
    %38 = vector.load %arg7[%c1_25, %c0_26] : memref<2x32xf32, #tpu.memory_space<vmem>>, vector<1x32xf32>
    %39 = vector.broadcast %38 : vector<1x32xf32> to vector<8x32xf32>
    %40 = arith.mulf %37, %39 : vector<8x32xf32>
    %cst_27 = arith.constant dense<0.000000e+00> : vector<8xf32>
    %41 = vector.multi_reduction <add>, %40, %cst_27 [1] : vector<8x32xf32> to vector<8xf32>
    %c0_28 = arith.constant 0 : index
    %c0_29 = arith.constant 0 : index
    %42 = memref.load %arg8[%c0_28, %c0_29] : memref<1x1xf32, #tpu.memory_space<smem>>
    %43 = vector.broadcast %42 : f32 to vector<8xf32>
    %44 = arith.addf %41, %43 : vector<8xf32>
    %45 = vector.shape_cast %44 : vector<8xf32> to vector<1x8xf32>
    %c0_30 = arith.constant 0 : index
    %c0_31 = arith.constant 0 : index
    %46 = vector.load %arg9[%c0_30, %c0_31] : memref<1x8xf32, #tpu.memory_space<vmem>>, vector<1x8xf32>
    tpu.vector_store %arg9[%c0_30, %c0_31], %45 {strides = array<i32>} : memref<1x8xf32, #tpu.memory_space<vmem>>, vector<1x8xf32>,
    return
  }
  func.func @transform_0(%arg0: i32) -> (i32, i32) {
    %c0_i32 = arith.constant 0 : i32
    %c0_i32_0 = arith.constant 0 : i32
    return %arg0, %c0_i32 : i32, i32
  }
  func.func @transform_1(%arg0: i32) -> (i32, i32) {
    %c0_i32 = arith.constant 0 : i32
    %c0_i32_0 = arith.constant 0 : i32
    %c0_i32_1 = arith.constant 0 : i32
    return %c0_i32, %c0_i32_0 : i32, i32
  }
  func.func @transform_2(%arg0: i32) -> (i32, i32) {
    %c0_i32 = arith.constant 0 : i32
    %c0_i32_0 = arith.constant 0 : i32
    %c0_i32_1 = arith.constant 0 : i32
    return %c0_i32, %c0_i32_0 : i32, i32
  }
  func.func @transform_3(%arg0: i32) -> (i32, i32) {
    %c0_i32 = arith.constant 0 : i32
    %c0_i32_0 = arith.constant 0 : i32
    %c0_i32_1 = arith.constant 0 : i32
    return %c0_i32, %c0_i32_0 : i32, i32
  }
  func.func @transform_4(%arg0: i32) -> (i32, i32) {
    %c0_i32 = arith.constant 0 : i32
    %c0_i32_0 = arith.constant 0 : i32
    %c0_i32_1 = arith.constant 0 : i32
    return %c0_i32, %c0_i32_0 : i32, i32
  }
  func.func @transform_5(%arg0: i32) -> (i32, i32) {
    %c0_i32 = arith.constant 0 : i32
    %c0_i32_0 = arith.constant 0 : i32
    %c0_i32_1 = arith.constant 0 : i32
    return %c0_i32, %c0_i32_0 : i32, i32
  }
  func.func @transform_6(%arg0: i32) -> (i32, i32) {
    %c0_i32 = arith.constant 0 : i32
    %c0_i32_0 = arith.constant 0 : i32
    %c0_i32_1 = arith.constant 0 : i32
    return %c0_i32, %c0_i32_0 : i32, i32
  }
  func.func @transform_7(%arg0: i32) -> (i32, i32) {
    %c0_i32 = arith.constant 0 : i32
    %c0_i32_0 = arith.constant 0 : i32
    %c0_i32_1 = arith.constant 0 : i32
    return %c0_i32, %c0_i32_0 : i32, i32
  }
  func.func @transform_8(%arg0: i32) -> (i32, i32) {
    %c0_i32 = arith.constant 0 : i32
    %c0_i32_0 = arith.constant 0 : i32
    return %arg0, %c0_i32 : i32, i32
  }
}

</mosaic_0001>

<bundles_post_ra>
// kernel: realestate_forward.1
= control target key start
LH: loop header
LB: loop body
LE: loop exit
PB: predicated region body
PF: predicated region fallthrough
CT: control target
= control target key end

     0   :  { %vm40_vm0 = vcmask 1043456   ;;  %vm36_vm1 = vcmask 64512   ;;  %s453_s0 = inlined_call_operand.vmem [shape: bf16[8,8], index: 0, kind: input, shape index: {}]   ;;  %s454_s1 = inlined_call_operand.vmem [shape: bf16[8,128], index: 1, kind: input, shape index: {}]   ;;  %s455_s2 = inlined_call_operand.vmem [shape: f32[3,128], index: 2, kind: input, shape index: {}]   ;;  %s456_s3 = inlined_call_operand.vmem [shape: bf16[128,64], index: 3, kind: input, shape index: {}]   ;;  %s457_s4 = inlined_call_operand.vmem [shape: f32[3,64], index: 4, kind: input, shape index: {}]   ;;  %s458_s5 = inlined_call_operand.vmem [shape: bf16[64,32], index: 5, kind: input, shape index: {}]   ;;  %s459_s6 = inlined_call_operand.vmem [shape: f32[2,32], index: 6, kind: input, shape index: {}]   ;;  %s460_s7 = inlined_call_operand.<no memory space> [shape: f32[1,1], index: 7, kind: input, shape index: {}]   ;;  %s461_s8 = inlined_call_operand.hbm [shape: f32[1,8], index: 8, kind: output, shape index: {}]  }
   0x1   :  { %v33_v0 = vld [vmem:[%s454_s1] sm:$0xf]  ;;  %v295_v2 = vld [vmem:[%s456_s3 + $0x38] sm:$0xff]  ;;  %v294_v4 = vld [vmem:[%s456_s3 + $0x30] sm:$0xff] }
   0x2   :  { %v42_v1 = vsel %vm40_vm0, %v33_v0, 0  ;;  %v32_v3 = vld [vmem:[%s453_s0] sm:$0xf]  ;;  %132 = vmatpush.bf16.msra.mxu1 %v295_v2 }
   0x3   :  { %51 = vmatpush.bf16.msra.mxu0 %v42_v1 }
   0x6   :  { %238 = vmatmul.msk.bf16.vlgmr.msra.gmra.mxu0 %vm36_vm1, %v32_v3 }
   0x7   :  { %14 = vsyncpa [#allocation4], 0  ;;  %133 = vmatpush.bf16.msra.mxu1 %v294_v4  ;;  %v293_v5 = vld [vmem:[%s456_s3 + $0x28] sm:$0xff]  ;;  %v292_v6 = vld [vmem:[%s456_s3 + $0x20] sm:$0xff]  ;;  %vm187_vm2 = vcmask 523264   ;;  %vm208_vm3 = vcmask 261120   ;;  %v216_v44 = vlaneseq  ;;  %v213_v45 = vstv %s460_s7 }
   0x8   :  { %v291_v7 = vld [vmem:[%s456_s3 + $0x18] sm:$0xff]  ;;  %v290_v8 = vld [vmem:[%s456_s3 + $0x10] sm:$0xff]  ;;  %v289_v9 = vld [vmem:[%s456_s3 + $0x8] sm:$0xff]  ;;  %s335_s21 = smov [#allocation3]   ;;  %s229_s25 = sshll.u32 %s461_s8, 4  ;;  %vm220_vm4 = vcmask 57344   ;;  %s230_s25 = int_to_ptr.hbm [resolvable:$true] %s229_s25 }
   0x9   :  { %v288_v10 = vld [vmem:[%s456_s3] sm:$0xff]  ;;  %v299_v11 = vld [vmem:[%s458_s5 + $0x18] sm:$0xff]  ;;  %v298_v23 = vld [vmem:[%s458_s5 + $0x10] sm:$0xff]  ;;  %v217_v46 = vand.u32 127, %v216_v44  ;;  %s227_s22 = sshll.u32 %s335_s21, 4  ;;  %s228_s22 = int_to_ptr.vmem [resolvable:$true] %s227_s22 }
   0xa   :  { %195 = vmatpush.bf16.msra.mxu2 %v299_v11  ;;  %v301_v12 = vld [vmem:[%s455_s2] ss:$0 sm:$0xff]  ;;  %v302_v15 = vld [vmem:[%s455_s2 + $0x1] ss:$0 sm:$0xff]  ;;  %v303_v17 = vld [vmem:[%s455_s2 + $0x2] ss:$0 sm:$0xff] }
   0xb   :  { %134 = vmatpush.bf16.msra.mxu1 %v293_v5  ;;  %v297_v24 = vld [vmem:[%s458_s5 + $0x8] sm:$0xff]  ;;  %v296_v25 = vld [vmem:[%s458_s5] sm:$0xff] }
   0xc   :  { %v304_v26 = vld [vmem:[%s457_s4] ss:$0 sm:$0xff]  ;;  %v305_v27 = vld [vmem:[%s457_s4 + $0x1] ss:$0 sm:$0xff]  ;;  %v306_v30 = vld [vmem:[%s457_s4 + $0x2] ss:$0 sm:$0xff] }
   0xd   :  { %v307_v36 = vld [vmem:[%s459_s6] ss:$0 sm:$0xff]  ;;  %v308_v39 = vld [vmem:[%s459_s6 + $0x1] ss:$0 sm:$0xff] }
   0xe   :  { %196 = vmatpush.bf16.msra.mxu2 %v298_v23 }
   0xf   :  { %135 = vmatpush.bf16.msra.mxu1 %v292_v6 }
  0x12   :  { %197 = vmatpush.bf16.msra.mxu2 %v297_v24 }
  0x13   :  { %136 = vmatpush.bf16.msra.mxu1 %v291_v7 }
  0x16   :  { %198 = vmatpush.bf16.msra.mxu2 %v296_v25 }
  0x17   :  { %137 = vmatpush.bf16.msra.mxu1 %v290_v8 }
  0x1b   :  { %138 = vmatpush.bf16.msra.mxu1 %v289_v9 }
  0x1f   :  { %139 = vmatpush.bf16.msra.mxu1 %v288_v10 }
  0x83   :  { %v53_v13 = vpop.f32.mrf.mxu0 }
  0x84   :  { %v54_v14 = vadd.f32 %v301_v12, %v53_v13 }
  0x86   :  { %v57_v16 = vmax.f32 %v54_v14, 0.0 }
  0x88   :  { %v60_v18 = vmul.f32 %v302_v15, %v57_v16 }
  0x8a   :  { %v63_v19 = vadd.f32 %v303_v17, %v60_v18 }
  0x8b   :  { %v55_v20 = vpop.f32.mrf.mxu0 }
  0x8c   :  { %v64_v21 = vmax.f32 %v63_v19, 0.0 }
  0x8e   :  { %v65_v22 = vpack.c.bf16 %v64_v21, %v64_v21 }
  0x90   :  { %140 = vmatmul.bf16.vlgmr.msra.gmra.mxu1 %v65_v22 }
 0x10d   :  { %v141_v28 = vpop.f32.mrf.mxu1 }
 0x10e   :  { %v142_v29 = vadd.f32 %v304_v26, %v141_v28 }
 0x110   :  { %v147_v31 = vmul.f32 %v305_v27, %v142_v29 }
 0x112   :  { %v150_v32 = vadd.f32 %v306_v30, %v147_v31 }
 0x114   :  { %v151_v33 = vmax.f32 %v150_v32, 0.0 }
 0x115   :  { %v143_v34 = vpop.f32.mrf.mxu1 }
 0x116   :  { %v152_v35 = vpack.c.bf16 %v151_v33, %v151_v33 }
 0x118   :  { %287 = vmatmul.msk.bf16.vlgmr.msra.gmra.mxu2 %vm187_vm2, %v152_v35 }
 0x19b   :  { %v200_v37 = vpop.f32.mrf.mxu2 }
 0x19c   :  { %v201_v38 = vadd.f32 %v307_v36, %v200_v37 }
 0x19e   :  { %v204_v40 = vmax.f32 %v201_v38, 0.0 }
 0x1a0   :  { %v207_v41 = vmul.f32 %v308_v39, %v204_v40 }
 0x1a2   :  { %v209_v42 = vsel %vm208_vm3, %v207_v41, 0.0 }
 0x1a3   :  { %v202_v43 = vpop.f32.mrf.mxu2  ;;  %210 = vadd.xlane.f32.xlu0 %v209_v42 }
 0x216   :  { %v211_v47 = vpop.xlane.xlu0 %210 }
 0x217   :  { %v214_v48 = vadd.f32 %v213_v45, %v211_v47 }
 0x219   :  { %v218_v49 = vperm.slane %v214_v48, %v217_v46 }
 0x21b   :  { %221 = vst.msk [vmem:[#allocation3] sm:$0x1] %vm220_vm4, %v218_v49 }
 0x21c   :  { %232 = dma.vmem_to_hbm [thread:$0]  %s228_s22, 16, %s230_s25, [#allocation4]  }
 0x21d   :  { %333 = dma.done.wait [#allocation4], 16  }
 0x21e   :  { %334 = vsyncadd [#allocation4], 4294967280 }
 0x21f   :  { %237 = vsyncpa [#allocation4], 1 }

</bundles_post_ra>
